<compile_context>
chip_gen: v6e
topology: v6e:2x2x1
jax: 0.10.0
libtpu: 0.0.40
codegen_flags: <defaults>
</compile_context>

<pallas_src>
import functools

import jax
import jax.numpy as jnp
from jax.experimental import pallas as pl
from jax.experimental.pallas import tpu as pltpu

_LANE = 128
_SCALE = 1.0e4          # "round to 4 decimals" quantization scale
_INV3 = 1.0 / 3.0
_INV5 = 1.0 / 5.0
_INV8 = 0.125


def _stencil_step(a, act, full):
    """One calc_neightbor_info + multi + sigmoid pass in the x1e4 domain.

    `a` holds the 9 neighborhood positions already quantized to integer-valued
    floats (a'_k = round(x_k * 1e4)); the sums below stay < 2^24, so the
    hand-CSE / reassociation is exact in f32.
    """
    a0, a1, a2, a3, a4, a5, a6, a7, a8 = a
    # Shared partial sums (hand-CSE of the 3/5/8-point stencil sums).
    s34 = a3 + a4
    r1 = s34 + a5                        # a3 + a4 + a5
    e01 = a0 + a1
    e67 = a6 + a7
    t = (e01 + a2) + r1 + (e67 + a8)     # total of all 9
    # Each b'_k feeds its sigmoid immediately so temporaries die early.
    x0 = act(a0, jnp.round((a1 + s34) * _INV3))
    x1 = act(a1, jnp.round(((a0 + a2) + r1) * _INV5))
    x3 = act(a3, jnp.round((e01 + e67 + a4) * _INV5))
    x4 = act(a4, jnp.round((t - a4) * _INV8))
    if not full:
        return x0, x1, x3, x4
    s45 = a4 + a5
    x2 = act(a2, jnp.round((a1 + s45) * _INV3))
    x5 = act(a5, jnp.round(((a1 + a2) + (a7 + a8) + a4) * _INV5))
    x6 = act(a6, jnp.round((s34 + a7) * _INV3))
    x7 = act(a7, jnp.round(((a6 + a8) + r1) * _INV5))
    x8 = act(a8, jnp.round((s45 + a7) * _INV3))
    return x0, x1, x2, x3, x4, x5, x6, x7, x8


def _nen_kernel(w_ref, x_ref, o_ref):
    # w_ref (SMEM f32[2]): weights with the 1e-4 un-scaling and the tanh
    # half-factor pre-folded:  w*h = 0.5 * w* * 1e-4, so
    #   sigmoid(w1*a + w2*b) == 0.5 * tanh(w1h*a' + w2h*b') + 0.5
    # where a' = a*1e4, b' = b*1e4 are the scaled-domain quantized values.
    w1h = w_ref[0]
    w2h = w_ref[1]

    def act(ak, bk):
        # sigmoid via EUP tanh (no exp + full-precision divide on the VPU).
        return jnp.tanh(w1h * ak + w2h * bk) * 0.5 + 0.5

    # x_ref: (9, TM, 128) -- each neighborhood position is a full (TM,128) tile.
    # ---- iteration 1: all 9 positions feed iteration 2 ----
    a = [jnp.round(x_ref[k] * _SCALE) for k in range(9)]
    x = _stencil_step(a, act, full=True)

    # ---- iteration 2: only positions 0,1,3,4 feed iteration 3 ----
    a = [jnp.round(v * _SCALE) for v in x]
    x0, x1, x3, x4 = _stencil_step(a, act, full=False)

    # ---- iteration 3: `nto` keeps only position 0 of each row ----
    a0 = jnp.round(x0 * _SCALE)
    a1 = jnp.round(x1 * _SCALE)
    a3 = jnp.round(x3 * _SCALE)
    a4 = jnp.round(x4 * _SCALE)
    b0 = jnp.round((a1 + a3 + a4) * _INV3)
    o_ref[...] = act(a0, b0)


@functools.partial(jax.jit, static_argnames=("tm",))
def nen_forward(x, w1, *, tm=512):
    """x: (N, 9) float32, w1: scalar -> (N,) float32 (matches Nen.forward)."""
    x = jnp.asarray(x, jnp.float32)
    n = x.shape[0]

    # Pre-fold the 1e-4 un-scaling and the tanh half-factor into the weights.
    w1 = jnp.asarray(w1, jnp.float32)
    w = (jnp.stack([w1, jnp.float32(1.0) - w1]).astype(jnp.float32)
         * jnp.float32(0.5e-4))

    # Tile-size / grid selection.  Batch factors as (M, 128) lane-dense rows.
    m_needed = pl.cdiv(n, _LANE)                 # 128-lane rows needed
    m_full = ((m_needed + 7) // 8) * 8           # rounded to a sublane multiple
    # Prefer >= 4 grid steps so the "parallel" axis can shard across v7x's two
    # TensorCores for moderate batches, but keep blocks at least 64 rows.
    tm = min(tm, max(64, ((pl.cdiv(m_needed, 4) + 7) // 8) * 8))
    tm = min(tm, m_full)
    tm = max(8, (tm // 8) * 8)
    m = pl.cdiv(m_needed, tm) * tm
    n_pad = m * _LANE

    # (N, 9) -> (9, M, 128), batch lane-dense; padded lanes are zeros and are
    # sliced away at the end (harmless compute).  With allow_input_fusion the
    # pad/transpose may fuse into the pallas_call input (no extra HBM pass).
    xp = jnp.pad(x, ((0, n_pad - n), (0, 0)))    # (n_pad, 9)
    xt = xp.T.reshape(9, m, _LANE)               # (9, M, 128)

    # VMEM budget at TM=512: 2 x 2.25 MiB pipelined input + 2 x 0.25 MiB output
    # + ~15-20 live (TM,128) f32 temporaries (~4-5 MiB) -- well inside the
    # 32 MiB scoped limit requested below (safe on v5e/v6e/v7x).
    out = pl.pallas_call(
        _nen_kernel,
        out_shape=jax.ShapeDtypeStruct((m, _LANE), jnp.float32),
        grid_spec=pltpu.PrefetchScalarGridSpec(
            num_scalar_prefetch=0,
            grid=(m // tm,),
            in_specs=[
                pl.BlockSpec(memory_space=pltpu.MemorySpace.SMEM),       # weights
                pl.BlockSpec((9, tm, _LANE), lambda i: (0, i, 0)),       # batch
            ],
            out_specs=pl.BlockSpec((tm, _LANE), lambda i: (i, 0)),
        ),
        compiler_params=pltpu.CompilerParams(
            dimension_semantics=("parallel",),
            vmem_limit_bytes=32 * 1024 * 1024,
            allow_input_fusion=[False, True],
        ),
    )(w, xt)
    return out.reshape(n_pad)[:n]


def _nen_reference(x, w1):
    """Pure-JAX transliteration of the PyTorch module's forward (f32)."""
    x = jnp.asarray(x, jnp.float32)
    w1 = jnp.asarray(w1, jnp.float32)
    w2 = 1.0 - w1

    def round4(v):
        return jnp.round(v * 1e4) * 1e-4

    for _ in range(3):
        a = round4(x)                                  # (N, 9)
        c = [a[:, k] for k in range(9)]
        b = jnp.stack(
            [
                round4((c[1] + c[3] + c[4]) / 3.0),
                round4((c[0] + c[3] + c[4] + c[5] + c[2]) / 5.0),
                round4((c[1] + c[4] + c[5]) / 3.0),
                round4((c[0] + c[1] + c[4] + c[7] + c[6]) / 5.0),
                round4((c[0] + c[1] + c[2] + c[3] + c[5] + c[6] + c[7] + c[8]) / 8.0),
                round4((c[2] + c[1] + c[4] + c[7] + c[8]) / 5.0),
                round4((c[7] + c[4] + c[3]) / 3.0),
                round4((c[6] + c[3] + c[4] + c[5] + c[8]) / 5.0),
                round4((c[7] + c[4] + c[5]) / 3.0),
            ],
            axis=1,
        )
        x = jax.nn.sigmoid(w1 * a + w2 * b)
    return x[:, 0]


if __name__ == "__main__":
    key = jax.random.PRNGKey(0)
    # Each sample is a flattened 3x3 neighborhood -> (N, 9)
    N = 8
    x = jax.random.uniform(key, (N, 9), dtype=jnp.float32)

    # Deterministic stand-in for np.random.rand(1) in __init__
    w1 = float(jax.random.uniform(jax.random.PRNGKey(42), ()))

    # The kernel reorders float additions / folds constants inside the
    # round-to-4-decimals quantization; a rare last-ulp tie can shift a
    # quantized value by 1e-4, which perturbs the final sigmoid by < 5e-5,
    # hence the 1e-4 tolerance (well inside the algorithm's own 1e-4 grain).
    TOL = 1e-4

    out = jax.block_until_ready(nen_forward(x, w1))
    ref = _nen_reference(x, w1)
    assert out.shape == (N,)
    assert jnp.allclose(out, ref, atol=TOL), (out, ref)

    # Larger check: exercises padding and the ordinary single-block path.
    N2 = 300
    x2 = jax.random.uniform(jax.random.PRNGKey(1), (N2, 9), dtype=jnp.float32)
    out2 = jax.block_until_ready(nen_forward(x2, w1))
    ref2 = _nen_reference(x2, w1)
    assert out2.shape == (N2,)
    assert jnp.allclose(out2, ref2, atol=TOL)

    # Multi-block check: exercises the (parallel) grid index maps.
    N3 = 12345
    x3 = jax.random.uniform(jax.random.PRNGKey(2), (N3, 9), dtype=jnp.float32)
    out3 = jax.block_until_ready(nen_forward(x3, w1))
    ref3 = _nen_reference(x3, w1)
    assert out3.shape == (N3,)
    assert jnp.allclose(out3, ref3, atol=TOL)

    print("KERNEL_OK")
</pallas_src>

<mosaic_0001>
module attributes {stable_mosaic.version = 11 : i64} {
  func.func @_nen_kernel(%arg0: i32, %arg1: memref<2xf32, #tpu.memory_space<smem>>, %arg2: memref<9x8x128xf32, #tpu.memory_space<vmem>>, %arg3: memref<8x128xf32, #tpu.memory_space<vmem>>) attributes {dimension_semantics = [#tpu.dimension_semantics<parallel>], iteration_bounds = array<i64: 1>, scalar_prefetch = 0 : i64, scratch_operands = 0 : i64, tpu.core_type = #tpu.core_type<tc>, window_params = [{transform_indices = @transform_0, window_bounds = array<i64: 2>}, {transform_indices = @transform_1, window_bounds = array<i64: 9, 8, 128>}, {transform_indices = @transform_2, window_bounds = array<i64: 8, 128>}]} {
    %c0 = arith.constant 0 : index
    %0 = memref.load %arg1[%c0] : memref<2xf32, #tpu.memory_space<smem>>
    %c1 = arith.constant 1 : index
    %1 = memref.load %arg1[%c1] : memref<2xf32, #tpu.memory_space<smem>>
    %c0_0 = arith.constant 0 : index
    %c0_1 = arith.constant 0 : index
    %c0_2 = arith.constant 0 : index
    %2 = vector.load %arg2[%c0_0, %c0_1, %c0_2] : memref<9x8x128xf32, #tpu.memory_space<vmem>>, vector<1x8x128xf32>
    %3 = vector.shape_cast %2 : vector<1x8x128xf32> to vector<8x128xf32>
    %cst = arith.constant 1.000000e+04 : f32
    %4 = vector.broadcast %cst : f32 to vector<8x128xf32>
    %5 = arith.mulf %3, %4 : vector<8x128xf32>
    %6 = math.roundeven %5 : vector<8x128xf32>
    %c1_3 = arith.constant 1 : index
    %c0_4 = arith.constant 0 : index
    %c0_5 = arith.constant 0 : index
    %7 = vector.load %arg2[%c1_3, %c0_4, %c0_5] : memref<9x8x128xf32, #tpu.memory_space<vmem>>, vector<1x8x128xf32>
    %8 = vector.shape_cast %7 : vector<1x8x128xf32> to vector<8x128xf32>
    %cst_6 = arith.constant 1.000000e+04 : f32
    %9 = vector.broadcast %cst_6 : f32 to vector<8x128xf32>
    %10 = arith.mulf %8, %9 : vector<8x128xf32>
    %11 = math.roundeven %10 : vector<8x128xf32>
    %c2 = arith.constant 2 : index
    %c0_7 = arith.constant 0 : index
    %c0_8 = arith.constant 0 : index
    %12 = vector.load %arg2[%c2, %c0_7, %c0_8] : memref<9x8x128xf32, #tpu.memory_space<vmem>>, vector<1x8x128xf32>
    %13 = vector.shape_cast %12 : vector<1x8x128xf32> to vector<8x128xf32>
    %cst_9 = arith.constant 1.000000e+04 : f32
    %14 = vector.broadcast %cst_9 : f32 to vector<8x128xf32>
    %15 = arith.mulf %13, %14 : vector<8x128xf32>
    %16 = math.roundeven %15 : vector<8x128xf32>
    %c3 = arith.constant 3 : index
    %c0_10 = arith.constant 0 : index
    %c0_11 = arith.constant 0 : index
    %17 = vector.load %arg2[%c3, %c0_10, %c0_11] : memref<9x8x128xf32, #tpu.memory_space<vmem>>, vector<1x8x128xf32>
    %18 = vector.shape_cast %17 : vector<1x8x128xf32> to vector<8x128xf32>
    %cst_12 = arith.constant 1.000000e+04 : f32
    %19 = vector.broadcast %cst_12 : f32 to vector<8x128xf32>
    %20 = arith.mulf %18, %19 : vector<8x128xf32>
    %21 = math.roundeven %20 : vector<8x128xf32>
    %c4 = arith.constant 4 : index
    %c0_13 = arith.constant 0 : index
    %c0_14 = arith.constant 0 : index
    %22 = vector.load %arg2[%c4, %c0_13, %c0_14] : memref<9x8x128xf32, #tpu.memory_space<vmem>>, vector<1x8x128xf32>
    %23 = vector.shape_cast %22 : vector<1x8x128xf32> to vector<8x128xf32>
    %cst_15 = arith.constant 1.000000e+04 : f32
    %24 = vector.broadcast %cst_15 : f32 to vector<8x128xf32>
    %25 = arith.mulf %23, %24 : vector<8x128xf32>
    %26 = math.roundeven %25 : vector<8x128xf32>
    %c5 = arith.constant 5 : index
    %c0_16 = arith.constant 0 : index
    %c0_17 = arith.constant 0 : index
    %27 = vector.load %arg2[%c5, %c0_16, %c0_17] : memref<9x8x128xf32, #tpu.memory_space<vmem>>, vector<1x8x128xf32>
    %28 = vector.shape_cast %27 : vector<1x8x128xf32> to vector<8x128xf32>
    %cst_18 = arith.constant 1.000000e+04 : f32
    %29 = vector.broadcast %cst_18 : f32 to vector<8x128xf32>
    %30 = arith.mulf %28, %29 : vector<8x128xf32>
    %31 = math.roundeven %30 : vector<8x128xf32>
    %c6 = arith.constant 6 : index
    %c0_19 = arith.constant 0 : index
    %c0_20 = arith.constant 0 : index
    %32 = vector.load %arg2[%c6, %c0_19, %c0_20] : memref<9x8x128xf32, #tpu.memory_space<vmem>>, vector<1x8x128xf32>
    %33 = vector.shape_cast %32 : vector<1x8x128xf32> to vector<8x128xf32>
    %cst_21 = arith.constant 1.000000e+04 : f32
    %34 = vector.broadcast %cst_21 : f32 to vector<8x128xf32>
    %35 = arith.mulf %33, %34 : vector<8x128xf32>
    %36 = math.roundeven %35 : vector<8x128xf32>
    %c7 = arith.constant 7 : index
    %c0_22 = arith.constant 0 : index
    %c0_23 = arith.constant 0 : index
    %37 = vector.load %arg2[%c7, %c0_22, %c0_23] : memref<9x8x128xf32, #tpu.memory_space<vmem>>, vector<1x8x128xf32>
    %38 = vector.shape_cast %37 : vector<1x8x128xf32> to vector<8x128xf32>
    %cst_24 = arith.constant 1.000000e+04 : f32
    %39 = vector.broadcast %cst_24 : f32 to vector<8x128xf32>
    %40 = arith.mulf %38, %39 : vector<8x128xf32>
    %41 = math.roundeven %40 : vector<8x128xf32>
    %c8 = arith.constant 8 : index
    %c0_25 = arith.constant 0 : index
    %c0_26 = arith.constant 0 : index
    %42 = vector.load %arg2[%c8, %c0_25, %c0_26] : memref<9x8x128xf32, #tpu.memory_space<vmem>>, vector<1x8x128xf32>
    %43 = vector.shape_cast %42 : vector<1x8x128xf32> to vector<8x128xf32>
    %cst_27 = arith.constant 1.000000e+04 : f32
    %44 = vector.broadcast %cst_27 : f32 to vector<8x128xf32>
    %45 = arith.mulf %43, %44 : vector<8x128xf32>
    %46 = math.roundeven %45 : vector<8x128xf32>
    %47 = arith.addf %21, %26 : vector<8x128xf32>
    %48 = arith.addf %47, %31 : vector<8x128xf32>
    %49 = arith.addf %6, %11 : vector<8x128xf32>
    %50 = arith.addf %36, %41 : vector<8x128xf32>
    %51 = arith.addf %49, %16 : vector<8x128xf32>
    %52 = arith.addf %51, %48 : vector<8x128xf32>
    %53 = arith.addf %50, %46 : vector<8x128xf32>
    %54 = arith.addf %52, %53 : vector<8x128xf32>
    %55 = arith.addf %11, %47 : vector<8x128xf32>
    %cst_28 = arith.constant 0.333333343 : f32
    %56 = vector.broadcast %cst_28 : f32 to vector<8x128xf32>
    %57 = arith.mulf %55, %56 : vector<8x128xf32>
    %58 = math.roundeven %57 : vector<8x128xf32>
    %59 = vector.broadcast %0 : f32 to vector<8x128xf32>
    %60 = arith.mulf %59, %6 : vector<8x128xf32>
    %61 = vector.broadcast %1 : f32 to vector<8x128xf32>
    %62 = arith.mulf %61, %58 : vector<8x128xf32>
    %63 = arith.addf %60, %62 : vector<8x128xf32>
    %64 = math.tanh %63 : vector<8x128xf32>
    %cst_29 = arith.constant 5.000000e-01 : f32
    %65 = vector.broadcast %cst_29 : f32 to vector<8x128xf32>
    %66 = arith.mulf %64, %65 : vector<8x128xf32>
    %cst_30 = arith.constant 5.000000e-01 : f32
    %67 = vector.broadcast %cst_30 : f32 to vector<8x128xf32>
    %68 = arith.addf %66, %67 : vector<8x128xf32>
    %69 = arith.addf %6, %16 : vector<8x128xf32>
    %70 = arith.addf %69, %48 : vector<8x128xf32>
    %cst_31 = arith.constant 2.000000e-01 : f32
    %71 = vector.broadcast %cst_31 : f32 to vector<8x128xf32>
    %72 = arith.mulf %70, %71 : vector<8x128xf32>
    %73 = math.roundeven %72 : vector<8x128xf32>
    %74 = vector.broadcast %0 : f32 to vector<8x128xf32>
    %75 = arith.mulf %74, %11 : vector<8x128xf32>
    %76 = vector.broadcast %1 : f32 to vector<8x128xf32>
    %77 = arith.mulf %76, %73 : vector<8x128xf32>
    %78 = arith.addf %75, %77 : vector<8x128xf32>
    %79 = math.tanh %78 : vector<8x128xf32>
    %cst_32 = arith.constant 5.000000e-01 : f32
    %80 = vector.broadcast %cst_32 : f32 to vector<8x128xf32>
    %81 = arith.mulf %79, %80 : vector<8x128xf32>
    %cst_33 = arith.constant 5.000000e-01 : f32
    %82 = vector.broadcast %cst_33 : f32 to vector<8x128xf32>
    %83 = arith.addf %81, %82 : vector<8x128xf32>
    %84 = arith.addf %49, %50 : vector<8x128xf32>
    %85 = arith.addf %84, %26 : vector<8x128xf32>
    %cst_34 = arith.constant 2.000000e-01 : f32
    %86 = vector.broadcast %cst_34 : f32 to vector<8x128xf32>
    %87 = arith.mulf %85, %86 : vector<8x128xf32>
    %88 = math.roundeven %87 : vector<8x128xf32>
    %89 = vector.broadcast %0 : f32 to vector<8x128xf32>
    %90 = arith.mulf %89, %21 : vector<8x128xf32>
    %91 = vector.broadcast %1 : f32 to vector<8x128xf32>
    %92 = arith.mulf %91, %88 : vector<8x128xf32>
    %93 = arith.addf %90, %92 : vector<8x128xf32>
    %94 = math.tanh %93 : vector<8x128xf32>
    %cst_35 = arith.constant 5.000000e-01 : f32
    %95 = vector.broadcast %cst_35 : f32 to vector<8x128xf32>
    %96 = arith.mulf %94, %95 : vector<8x128xf32>
    %cst_36 = arith.constant 5.000000e-01 : f32
    %97 = vector.broadcast %cst_36 : f32 to vector<8x128xf32>
    %98 = arith.addf %96, %97 : vector<8x128xf32>
    %99 = arith.subf %54, %26 : vector<8x128xf32>
    %cst_37 = arith.constant 1.250000e-01 : f32
    %100 = vector.broadcast %cst_37 : f32 to vector<8x128xf32>
    %101 = arith.mulf %99, %100 : vector<8x128xf32>
    %102 = math.roundeven %101 : vector<8x128xf32>
    %103 = vector.broadcast %0 : f32 to vector<8x128xf32>
    %104 = arith.mulf %103, %26 : vector<8x128xf32>
    %105 = vector.broadcast %1 : f32 to vector<8x128xf32>
    %106 = arith.mulf %105, %102 : vector<8x128xf32>
    %107 = arith.addf %104, %106 : vector<8x128xf32>
    %108 = math.tanh %107 : vector<8x128xf32>
    %cst_38 = arith.constant 5.000000e-01 : f32
    %109 = vector.broadcast %cst_38 : f32 to vector<8x128xf32>
    %110 = arith.mulf %108, %109 : vector<8x128xf32>
    %cst_39 = arith.constant 5.000000e-01 : f32
    %111 = vector.broadcast %cst_39 : f32 to vector<8x128xf32>
    %112 = arith.addf %110, %111 : vector<8x128xf32>
    %113 = arith.addf %26, %31 : vector<8x128xf32>
    %114 = arith.addf %11, %113 : vector<8x128xf32>
    %cst_40 = arith.constant 0.333333343 : f32
    %115 = vector.broadcast %cst_40 : f32 to vector<8x128xf32>
    %116 = arith.mulf %114, %115 : vector<8x128xf32>
    %117 = math.roundeven %116 : vector<8x128xf32>
    %118 = vector.broadcast %0 : f32 to vector<8x128xf32>
    %119 = arith.mulf %118, %16 : vector<8x128xf32>
    %120 = vector.broadcast %1 : f32 to vector<8x128xf32>
    %121 = arith.mulf %120, %117 : vector<8x128xf32>
    %122 = arith.addf %119, %121 : vector<8x128xf32>
    %123 = math.tanh %122 : vector<8x128xf32>
    %cst_41 = arith.constant 5.000000e-01 : f32
    %124 = vector.broadcast %cst_41 : f32 to vector<8x128xf32>
    %125 = arith.mulf %123, %124 : vector<8x128xf32>
    %cst_42 = arith.constant 5.000000e-01 : f32
    %126 = vector.broadcast %cst_42 : f32 to vector<8x128xf32>
    %127 = arith.addf %125, %126 : vector<8x128xf32>
    %128 = arith.addf %11, %16 : vector<8x128xf32>
    %129 = arith.addf %41, %46 : vector<8x128xf32>
    %130 = arith.addf %128, %129 : vector<8x128xf32>
    %131 = arith.addf %130, %26 : vector<8x128xf32>
    %cst_43 = arith.constant 2.000000e-01 : f32
    %132 = vector.broadcast %cst_43 : f32 to vector<8x128xf32>
    %133 = arith.mulf %131, %132 : vector<8x128xf32>
    %134 = math.roundeven %133 : vector<8x128xf32>
    %135 = vector.broadcast %0 : f32 to vector<8x128xf32>
    %136 = arith.mulf %135, %31 : vector<8x128xf32>
    %137 = vector.broadcast %1 : f32 to vector<8x128xf32>
    %138 = arith.mulf %137, %134 : vector<8x128xf32>
    %139 = arith.addf %136, %138 : vector<8x128xf32>
    %140 = math.tanh %139 : vector<8x128xf32>
    %cst_44 = arith.constant 5.000000e-01 : f32
    %141 = vector.broadcast %cst_44 : f32 to vector<8x128xf32>
    %142 = arith.mulf %140, %141 : vector<8x128xf32>
    %cst_45 = arith.constant 5.000000e-01 : f32
    %143 = vector.broadcast %cst_45 : f32 to vector<8x128xf32>
    %144 = arith.addf %142, %143 : vector<8x128xf32>
    %145 = arith.addf %47, %41 : vector<8x128xf32>
    %cst_46 = arith.constant 0.333333343 : f32
    %146 = vector.broadcast %cst_46 : f32 to vector<8x128xf32>
    %147 = arith.mulf %145, %146 : vector<8x128xf32>
    %148 = math.roundeven %147 : vector<8x128xf32>
    %149 = vector.broadcast %0 : f32 to vector<8x128xf32>
    %150 = arith.mulf %149, %36 : vector<8x128xf32>
    %151 = vector.broadcast %1 : f32 to vector<8x128xf32>
    %152 = arith.mulf %151, %148 : vector<8x128xf32>
    %153 = arith.addf %150, %152 : vector<8x128xf32>
    %154 = math.tanh %153 : vector<8x128xf32>
    %cst_47 = arith.constant 5.000000e-01 : f32
    %155 = vector.broadcast %cst_47 : f32 to vector<8x128xf32>
    %156 = arith.mulf %154, %155 : vector<8x128xf32>
    %cst_48 = arith.constant 5.000000e-01 : f32
    %157 = vector.broadcast %cst_48 : f32 to vector<8x128xf32>
    %158 = arith.addf %156, %157 : vector<8x128xf32>
    %159 = arith.addf %36, %46 : vector<8x128xf32>
    %160 = arith.addf %159, %48 : vector<8x128xf32>
    %cst_49 = arith.constant 2.000000e-01 : f32
    %161 = vector.broadcast %cst_49 : f32 to vector<8x128xf32>
    %162 = arith.mulf %160, %161 : vector<8x128xf32>
    %163 = math.roundeven %162 : vector<8x128xf32>
    %164 = vector.broadcast %0 : f32 to vector<8x128xf32>
    %165 = arith.mulf %164, %41 : vector<8x128xf32>
    %166 = vector.broadcast %1 : f32 to vector<8x128xf32>
    %167 = arith.mulf %166, %163 : vector<8x128xf32>
    %168 = arith.addf %165, %167 : vector<8x128xf32>
    %169 = math.tanh %168 : vector<8x128xf32>
    %cst_50 = arith.constant 5.000000e-01 : f32
    %170 = vector.broadcast %cst_50 : f32 to vector<8x128xf32>
    %171 = arith.mulf %169, %170 : vector<8x128xf32>
    %cst_51 = arith.constant 5.000000e-01 : f32
    %172 = vector.broadcast %cst_51 : f32 to vector<8x128xf32>
    %173 = arith.addf %171, %172 : vector<8x128xf32>
    %174 = arith.addf %113, %41 : vector<8x128xf32>
    %cst_52 = arith.constant 0.333333343 : f32
    %175 = vector.broadcast %cst_52 : f32 to vector<8x128xf32>
    %176 = arith.mulf %174, %175 : vector<8x128xf32>
    %177 = math.roundeven %176 : vector<8x128xf32>
    %178 = vector.broadcast %0 : f32 to vector<8x128xf32>
    %179 = arith.mulf %178, %46 : vector<8x128xf32>
    %180 = vector.broadcast %1 : f32 to vector<8x128xf32>
    %181 = arith.mulf %180, %177 : vector<8x128xf32>
    %182 = arith.addf %179, %181 : vector<8x128xf32>
    %183 = math.tanh %182 : vector<8x128xf32>
    %cst_53 = arith.constant 5.000000e-01 : f32
    %184 = vector.broadcast %cst_53 : f32 to vector<8x128xf32>
    %185 = arith.mulf %183, %184 : vector<8x128xf32>
    %cst_54 = arith.constant 5.000000e-01 : f32
    %186 = vector.broadcast %cst_54 : f32 to vector<8x128xf32>
    %187 = arith.addf %185, %186 : vector<8x128xf32>
    %cst_55 = arith.constant 1.000000e+04 : f32
    %188 = vector.broadcast %cst_55 : f32 to vector<8x128xf32>
    %189 = arith.mulf %68, %188 : vector<8x128xf32>
    %190 = math.roundeven %189 : vector<8x128xf32>
    %cst_56 = arith.constant 1.000000e+04 : f32
    %191 = vector.broadcast %cst_56 : f32 to vector<8x128xf32>
    %192 = arith.mulf %83, %191 : vector<8x128xf32>
    %193 = math.roundeven %192 : vector<8x128xf32>
    %cst_57 = arith.constant 1.000000e+04 : f32
    %194 = vector.broadcast %cst_57 : f32 to vector<8x128xf32>
    %195 = arith.mulf %127, %194 : vector<8x128xf32>
    %196 = math.roundeven %195 : vector<8x128xf32>
    %cst_58 = arith.constant 1.000000e+04 : f32
    %197 = vector.broadcast %cst_58 : f32 to vector<8x128xf32>
    %198 = arith.mulf %98, %197 : vector<8x128xf32>
    %199 = math.roundeven %198 : vector<8x128xf32>
    %cst_59 = arith.constant 1.000000e+04 : f32
    %200 = vector.broadcast %cst_59 : f32 to vector<8x128xf32>
    %201 = arith.mulf %112, %200 : vector<8x128xf32>
    %202 = math.roundeven %201 : vector<8x128xf32>
    %cst_60 = arith.constant 1.000000e+04 : f32
    %203 = vector.broadcast %cst_60 : f32 to vector<8x128xf32>
    %204 = arith.mulf %144, %203 : vector<8x128xf32>
    %205 = math.roundeven %204 : vector<8x128xf32>
    %cst_61 = arith.constant 1.000000e+04 : f32
    %206 = vector.broadcast %cst_61 : f32 to vector<8x128xf32>
    %207 = arith.mulf %158, %206 : vector<8x128xf32>
    %208 = math.roundeven %207 : vector<8x128xf32>
    %cst_62 = arith.constant 1.000000e+04 : f32
    %209 = vector.broadcast %cst_62 : f32 to vector<8x128xf32>
    %210 = arith.mulf %173, %209 : vector<8x128xf32>
    %211 = math.roundeven %210 : vector<8x128xf32>
    %cst_63 = arith.constant 1.000000e+04 : f32
    %212 = vector.broadcast %cst_63 : f32 to vector<8x128xf32>
    %213 = arith.mulf %187, %212 : vector<8x128xf32>
    %214 = math.roundeven %213 : vector<8x128xf32>
    %215 = arith.addf %199, %202 : vector<8x128xf32>
    %216 = arith.addf %215, %205 : vector<8x128xf32>
    %217 = arith.addf %190, %193 : vector<8x128xf32>
    %218 = arith.addf %208, %211 : vector<8x128xf32>
    %219 = arith.addf %217, %196 : vector<8x128xf32>
    %220 = arith.addf %219, %216 : vector<8x128xf32>
    %221 = arith.addf %218, %214 : vector<8x128xf32>
    %222 = arith.addf %220, %221 : vector<8x128xf32>
    %223 = arith.addf %193, %215 : vector<8x128xf32>
    %cst_64 = arith.constant 0.333333343 : f32
    %224 = vector.broadcast %cst_64 : f32 to vector<8x128xf32>
    %225 = arith.mulf %223, %224 : vector<8x128xf32>
    %226 = math.roundeven %225 : vector<8x128xf32>
    %227 = vector.broadcast %0 : f32 to vector<8x128xf32>
    %228 = arith.mulf %227, %190 : vector<8x128xf32>
    %229 = vector.broadcast %1 : f32 to vector<8x128xf32>
    %230 = arith.mulf %229, %226 : vector<8x128xf32>
    %231 = arith.addf %228, %230 : vector<8x128xf32>
    %232 = math.tanh %231 : vector<8x128xf32>
    %cst_65 = arith.constant 5.000000e-01 : f32
    %233 = vector.broadcast %cst_65 : f32 to vector<8x128xf32>
    %234 = arith.mulf %232, %233 : vector<8x128xf32>
    %cst_66 = arith.constant 5.000000e-01 : f32
    %235 = vector.broadcast %cst_66 : f32 to vector<8x128xf32>
    %236 = arith.addf %234, %235 : vector<8x128xf32>
    %237 = arith.addf %190, %196 : vector<8x128xf32>
    %238 = arith.addf %237, %216 : vector<8x128xf32>
    %cst_67 = arith.constant 2.000000e-01 : f32
    %239 = vector.broadcast %cst_67 : f32 to vector<8x128xf32>
    %240 = arith.mulf %238, %239 : vector<8x128xf32>
    %241 = math.roundeven %240 : vector<8x128xf32>
    %242 = vector.broadcast %0 : f32 to vector<8x128xf32>
    %243 = arith.mulf %242, %193 : vector<8x128xf32>
    %244 = vector.broadcast %1 : f32 to vector<8x128xf32>
    %245 = arith.mulf %244, %241 : vector<8x128xf32>
    %246 = arith.addf %243, %245 : vector<8x128xf32>
    %247 = math.tanh %246 : vector<8x128xf32>
    %cst_68 = arith.constant 5.000000e-01 : f32
    %248 = vector.broadcast %cst_68 : f32 to vector<8x128xf32>
    %249 = arith.mulf %247, %248 : vector<8x128xf32>
    %cst_69 = arith.constant 5.000000e-01 : f32
    %250 = vector.broadcast %cst_69 : f32 to vector<8x128xf32>
    %251 = arith.addf %249, %250 : vector<8x128xf32>
    %252 = arith.addf %217, %218 : vector<8x128xf32>
    %253 = arith.addf %252, %202 : vector<8x128xf32>
    %cst_70 = arith.constant 2.000000e-01 : f32
    %254 = vector.broadcast %cst_70 : f32 to vector<8x128xf32>
    %255 = arith.mulf %253, %254 : vector<8x128xf32>
    %256 = math.roundeven %255 : vector<8x128xf32>
    %257 = vector.broadcast %0 : f32 to vector<8x128xf32>
    %258 = arith.mulf %257, %199 : vector<8x128xf32>
    %259 = vector.broadcast %1 : f32 to vector<8x128xf32>
    %260 = arith.mulf %259, %256 : vector<8x128xf32>
    %261 = arith.addf %258, %260 : vector<8x128xf32>
    %262 = math.tanh %261 : vector<8x128xf32>
    %cst_71 = arith.constant 5.000000e-01 : f32
    %263 = vector.broadcast %cst_71 : f32 to vector<8x128xf32>
    %264 = arith.mulf %262, %263 : vector<8x128xf32>
    %cst_72 = arith.constant 5.000000e-01 : f32
    %265 = vector.broadcast %cst_72 : f32 to vector<8x128xf32>
    %266 = arith.addf %264, %265 : vector<8x128xf32>
    %267 = arith.subf %222, %202 : vector<8x128xf32>
    %cst_73 = arith.constant 1.250000e-01 : f32
    %268 = vector.broadcast %cst_73 : f32 to vector<8x128xf32>
    %269 = arith.mulf %267, %268 : vector<8x128xf32>
    %270 = math.roundeven %269 : vector<8x128xf32>
    %271 = vector.broadcast %0 : f32 to vector<8x128xf32>
    %272 = arith.mulf %271, %202 : vector<8x128xf32>
    %273 = vector.broadcast %1 : f32 to vector<8x128xf32>
    %274 = arith.mulf %273, %270 : vector<8x128xf32>
    %275 = arith.addf %272, %274 : vector<8x128xf32>
    %276 = math.tanh %275 : vector<8x128xf32>
    %cst_74 = arith.constant 5.000000e-01 : f32
    %277 = vector.broadcast %cst_74 : f32 to vector<8x128xf32>
    %278 = arith.mulf %276, %277 : vector<8x128xf32>
    %cst_75 = arith.constant 5.000000e-01 : f32
    %279 = vector.broadcast %cst_75 : f32 to vector<8x128xf32>
    %280 = arith.addf %278, %279 : vector<8x128xf32>
    %cst_76 = arith.constant 1.000000e+04 : f32
    %281 = vector.broadcast %cst_76 : f32 to vector<8x128xf32>
    %282 = arith.mulf %236, %281 : vector<8x128xf32>
    %283 = math.roundeven %282 : vector<8x128xf32>
    %cst_77 = arith.constant 1.000000e+04 : f32
    %284 = vector.broadcast %cst_77 : f32 to vector<8x128xf32>
    %285 = arith.mulf %251, %284 : vector<8x128xf32>
    %286 = math.roundeven %285 : vector<8x128xf32>
    %cst_78 = arith.constant 1.000000e+04 : f32
    %287 = vector.broadcast %cst_78 : f32 to vector<8x128xf32>
    %288 = arith.mulf %266, %287 : vector<8x128xf32>
    %289 = math.roundeven %288 : vector<8x128xf32>
    %cst_79 = arith.constant 1.000000e+04 : f32
    %290 = vector.broadcast %cst_79 : f32 to vector<8x128xf32>
    %291 = arith.mulf %280, %290 : vector<8x128xf32>
    %292 = math.roundeven %291 : vector<8x128xf32>
    %293 = arith.addf %286, %289 : vector<8x128xf32>
    %294 = arith.addf %293, %292 : vector<8x128xf32>
    %cst_80 = arith.constant 0.333333343 : f32
    %295 = vector.broadcast %cst_80 : f32 to vector<8x128xf32>
    %296 = arith.mulf %294, %295 : vector<8x128xf32>
    %297 = math.roundeven %296 : vector<8x128xf32>
    %298 = vector.broadcast %0 : f32 to vector<8x128xf32>
    %299 = arith.mulf %298, %283 : vector<8x128xf32>
    %300 = vector.broadcast %1 : f32 to vector<8x128xf32>
    %301 = arith.mulf %300, %297 : vector<8x128xf32>
    %302 = arith.addf %299, %301 : vector<8x128xf32>
    %303 = math.tanh %302 : vector<8x128xf32>
    %cst_81 = arith.constant 5.000000e-01 : f32
    %304 = vector.broadcast %cst_81 : f32 to vector<8x128xf32>
    %305 = arith.mulf %303, %304 : vector<8x128xf32>
    %cst_82 = arith.constant 5.000000e-01 : f32
    %306 = vector.broadcast %cst_82 : f32 to vector<8x128xf32>
    %307 = arith.addf %305, %306 : vector<8x128xf32>
    %c0_83 = arith.constant 0 : index
    %c0_84 = arith.constant 0 : index
    %308 = vector.load %arg3[%c0_83, %c0_84] : memref<8x128xf32, #tpu.memory_space<vmem>>, vector<8x128xf32>
    tpu.vector_store %arg3[%c0_83, %c0_84], %307 {strides = array<i32>} : memref<8x128xf32, #tpu.memory_space<vmem>>, vector<8x128xf32>,
    return
  }
  func.func @transform_0(%arg0: i32) -> i32 {
    %c0_i32 = arith.constant 0 : i32
    %c0_i32_0 = arith.constant 0 : i32
    return %c0_i32 : i32
  }
  func.func @transform_1(%arg0: i32) -> (i32, i32, i32) {
    %c0_i32 = arith.constant 0 : i32
    %c0_i32_0 = arith.constant 0 : i32
    %c0_i32_1 = arith.constant 0 : i32
    return %c0_i32, %arg0, %c0_i32_0 : i32, i32, i32
  }
  func.func @transform_2(%arg0: i32) -> (i32, i32) {
    %c0_i32 = arith.constant 0 : i32
    %c0_i32_0 = arith.constant 0 : i32
    return %arg0, %c0_i32 : i32, i32
  }
}

</mosaic_0001>

<bundles_post_ra>
// kernel: nen_forward.1
= control target key start
LH: loop header
LB: loop body
LE: loop exit
PB: predicated region body
PF: predicated region fallthrough
CT: control target
= control target key end

     0   :  { %7 = vsyncpa [#allocation3], 0  ;;  %s869_s0 = inlined_call_operand.vmem [shape: f32[2], index: 0, kind: input, shape index: {}]   ;;  %s870_s1 = inlined_call_operand.vmem [shape: f32[9,8,128], index: 1, kind: input, shape index: {}]   ;;  %s871_s2 = inlined_call_operand.vmem [shape: f32[8,128], index: 2, kind: output, shape index: {}]  }
   0x1   :  { %s14_s11 = sshll.u32 %s869_s0, 4  ;;  %s15_s11 = int_to_ptr.vmem [resolvable:$true] %s14_s11 }
   0x2   :  { %s573_s12 = scalar_lea.vmem %s15_s11, 16  ;;  %p578_p1 = scmp.lt.s32.totalorder %s15_s11, %s15_s11 }
   0x3   :  { %p574_p0 = scmp.ne.s32.totalorder %s15_s11, %s573_s12  ;;  %p579_p2 = scmp.lt.s32.totalorder %s573_s12, %s573_s12 }
   0x5   :  { %p580_p3 = por %p579_p2, %p578_p1 }
   0x7   :  { %p581_p4 = pnand %p580_p3, %p574_p0 }
   0x9   :  { %584 = shalt.err (!%p581_p4)
}
   0xa   :  { %s587_s13 = smov [#allocation2]  }
   0xb   :  { %17 = dma.vmem_to_smem %s15_s11, 16, %s587_s13, [#allocation3]  }
   0xc   :  { %585 = dma.done.wait [#allocation3], 16  }
   0xd   :  { %586 = vsyncadd [#allocation3], 4294967280 }
   0xe   :  { %23 = sfence }
   0xf   :  { %v26_v0 = vld [vmem:[%s870_s1] sm:$0xff]  ;;  %v248_v1 = vld [vmem:[%s870_s1 + $0x8] sm:$0xff]  ;;  %v249_v2 = vld [vmem:[%s870_s1 + $0x10] sm:$0xff]  ;;  %s673_s3 = sld [smem:[#allocation2 + $0x1]] }
  0x10   :  { %v27_v3 = vmul.f32 10000.0, %v26_v0  ;;  %v31_v4 = vmul.f32 10000.0, %v248_v1  ;;  %v35_v5 = vmul.f32 10000.0, %v249_v2  ;;  %v250_v6 = vld [vmem:[%s870_s1 + $0x18] sm:$0xff]  ;;  %v251_v15 = vld [vmem:[%s870_s1 + $0x20] sm:$0xff]  ;;  %v252_v20 = vld [vmem:[%s870_s1 + $0x28] sm:$0xff] }
  0x11   :  { %v39_v10 = vmul.f32 10000.0, %v250_v6  ;;  %v43_v28 = vmul.f32 10000.0, %v251_v15  ;;  %v47_v32 = vmul.f32 10000.0, %v252_v20  ;;  %v253_v41 = vld [vmem:[%s870_s1 + $0x30] sm:$0xff]  ;;  %v254_v46 = vld [vmem:[%s870_s1 + $0x38] sm:$0xff]  ;;  %v255_v47 = vld [vmem:[%s870_s1 + $0x40] sm:$0xff] }
  0x12   :  { %v256_v7 = vand.u32 2147483647, %v27_v3  ;;  %v258_v8 = vcvt.f32.s32 %v27_v3  ;;  %v264_v9 = vand.u32 2147483647, %v31_v4  ;;  %v261_v11 = vand.u32 2147483648, %v27_v3  ;;  %s669_s1 = sld [smem:[#allocation2]] }
  0x13   :  { %v266_v12 = vcvt.f32.s32 %v31_v4  ;;  %v272_v13 = vand.u32 2147483647, %v35_v5  ;;  %v274_v14 = vcvt.f32.s32 %v35_v5  ;;  %v269_v19 = vand.u32 2147483648, %v31_v4 }
  0x14   :  { %vm621_vm0 = vcmp.lt.f32.partialorder %v256_v7, 8388608.0  ;;  %v259_v17 = vcvt.s32.f32 %v258_v8  ;;  %vm625_vm1 = vcmp.lt.f32.partialorder %v264_v9, 8388608.0  ;;  %v277_v23 = vand.u32 2147483648, %v35_v5 }
  0x15   :  { %v267_v21 = vcvt.s32.f32 %v266_v12  ;;  %v275_v22 = vcvt.s32.f32 %v274_v14  ;;  %v280_v24 = vand.u32 2147483647, %v39_v10  ;;  %vm632_vm2 = vcmp.lt.f32.partialorder %v272_v13, 8388608.0 }
  0x16   :  { %v260_v25 = vand.u32 2147483647, %v259_v17  ;;  %v282_v27 = vcvt.f32.s32 %v39_v10  ;;  %v285_v31 = vand.u32 2147483648, %v39_v10  ;;  %v288_v35 = vand.u32 2147483647, %v43_v28 }
  0x17   :  { %v268_v29 = vand.u32 2147483647, %v267_v21  ;;  %v276_v30 = vand.u32 2147483647, %v275_v22  ;;  %v290_v36 = vcvt.f32.s32 %v43_v28  ;;  %vm636_vm3 = vcmp.lt.f32.partialorder %v280_v24, 8388608.0 }
  0x18   :  { %v262_v33 = vor.u32 %v261_v11, %v260_v25  ;;  %v283_v34 = vcvt.s32.f32 %v282_v27  ;;  %v296_v40 = vand.u32 2147483647, %v47_v32  ;;  %v293_v45 = vand.u32 2147483648, %v43_v28 }
  0x19   :  { %v270_v37 = vor.u32 %v269_v19, %v268_v29  ;;  %v278_v38 = vor.u32 %v277_v23, %v276_v30  ;;  %v291_v44 = vcvt.s32.f32 %v290_v36  ;;  %vm661_vm4 = vcmp.lt.f32.partialorder %v288_v35, 8388608.0 }
  0x1a   :  { %v645_v42 = vsel %vm621_vm0, %v262_v33, %v27_v3  ;;  %v284_v43 = vand.u32 2147483647, %v283_v34  ;;  %v298_v51 = vcvt.f32.s32 %v47_v32  ;;  %vm665_vm5 = vcmp.lt.f32.partialorder %v296_v40, 8388608.0 }
  0x1b   :  { %v655_v48 = vsel %vm625_vm1, %v270_v37, %v31_v4  ;;  %v659_v49 = vsel %vm632_vm2, %v278_v38, %v35_v5  ;;  %v292_v53 = vand.u32 2147483647, %v291_v44  ;;  %v51_v55 = vmul.f32 10000.0, %v253_v41 }
  0x1c   :  { %v286_v52 = vor.u32 %v285_v31, %v284_v43  ;;  %v299_v56 = vcvt.s32.f32 %v298_v51  ;;  %v301_v57 = vand.u32 2147483648, %v47_v32  ;;  %v55_v58 = vmul.f32 10000.0, %v254_v46 }
  0x1d   :  { %v59_v59 = vmul.f32 10000.0, %v255_v47  ;;  %v294_v60 = vor.u32 %v293_v45, %v292_v53  ;;  %v304_v61 = vand.u32 2147483647, %v51_v55  ;;  %v306_v62 = vcvt.f32.s32 %v51_v55 }
  0x1e   :  { %v63_v63 = vadd.f32 %v655_v48, %v645_v42  ;;  %v287_v0 = vsel %vm636_vm3, %v286_v52, %v39_v10  ;;  %v300_v1 = vand.u32 2147483647, %v299_v56  ;;  %v312_v2 = vand.u32 2147483647, %v55_v58 }
  0x1f   :  { %v314_v3 = vcvt.f32.s32 %v55_v58  ;;  %v679_v4 = vsel %vm661_vm4, %v294_v60, %v43_v28  ;;  %vm681_vm6 = vcmp.lt.f32.partialorder %v304_v61, 8388608.0  ;;  %v307_v6 = vcvt.s32.f32 %v306_v62 }
  0x20   :  { %v309_v7 = vand.u32 2147483648, %v51_v55  ;;  %v302_v8 = vor.u32 %v301_v57, %v300_v1  ;;  %vm685_vm7 = vcmp.lt.f32.partialorder %v312_v2, 8388608.0  ;;  %v317_v10 = vand.u32 2147483648, %v55_v58 }
  0x21   :  { %v315_v11 = vcvt.s32.f32 %v314_v3  ;;  %v308_v12 = vand.u32 2147483647, %v307_v6  ;;  %v320_v13 = vand.u32 2147483647, %v59_v59  ;;  %v322_v14 = vcvt.f32.s32 %v59_v59 }
  0x22   :  { %v61_v15 = vadd.f32 %v679_v4, %v287_v0  ;;  %v692_v16 = vsel %vm665_vm5, %v302_v8, %v47_v32  ;;  %v325_v18 = vand.u32 2147483648, %v59_v59  ;;  %v65_v19 = vadd.f32 %v659_v49, %v63_v63 }
  0x23   :  { %v316_v17 = vand.u32 2147483647, %v315_v11  ;;  %v310_v20 = vor.u32 %v309_v7, %v308_v12  ;;  %v323_v21 = vcvt.s32.f32 %v322_v14  ;;  %v80_v25 = vadd.f32 %v659_v49, %v645_v42 }
  0x24   :  { %v696_v22 = vadd.f32 %v692_v16, %v61_v15  ;;  %v69_v23 = vadd.f32 %v655_v48, %v61_v15  ;;  %v706_v29 = vstv %s669_s1  ;;  %vm321_vm8 = vcmp.lt.f32.partialorder %v320_v13, 8388608.0 }
  0x25   :  { %v318_v24 = vor.u32 %v317_v10, %v316_v17  ;;  %v703_v26 = vsel %vm681_vm6, %v310_v20, %v51_v55  ;;  %v324_v27 = vand.u32 2147483647, %v323_v21  ;;  %v713_v31 = vstv %s673_s3 }
  0x26   :  { %v70_v28 = vmul.f32 0.33333334, %v69_v23  ;;  %v81_v32 = vadd.f32 %v80_v25, %v696_v22  ;;  %v66_v35 = vadd.f32 %v65_v19, %v696_v22  ;;  %v73_v38 = vmul.f32 %v645_v42, %v706_v29 }
  0x27   :  { %v710_v30 = vsel %vm685_vm7, %v318_v24, %v55_v58  ;;  %v326_v33 = vor.u32 %v325_v18, %v324_v27  ;;  %v84_v40 = vmul.f32 %v655_v48, %v706_v29  ;;  %v94_v51 = vmul.f32 %v287_v0, %v706_v29 }
  0x28   :  { %v64_v34 = vadd.f32 %v710_v30, %v703_v26  ;;  %v330_v36 = vcvt.f32.s32 %v70_v28  ;;  %v328_v37 = vand.u32 2147483647, %v70_v28  ;;  %v82_v39 = vmul.f32 0.2, %v81_v32 }
  0x29   :  { %v723_v41 = vsel %vm321_vm8, %v326_v33, %v59_v59  ;;  %v333_v44 = vand.u32 2147483648, %v70_v28  ;;  %v730_v42 = vmul.f32 %v679_v4, %v706_v29  ;;  %v734_v54 = vadd.f32 %v692_v16, %v679_v4 }
  0x2a   :  { %v331_v43 = vcvt.s32.f32 %v330_v36  ;;  %v90_v45 = vadd.f32 %v64_v34, %v63_v63  ;;  %v67_v46 = vadd.f32 %v723_v41, %v64_v34  ;;  %v336_v47 = vand.u32 2147483647, %v82_v39 }
  0x2b   :  { %v338_v50 = vcvt.f32.s32 %v82_v39  ;;  %vm329_vm9 = vcmp.lt.f32.partialorder %v328_v37, 8388608.0  ;;  %v341_v57 = vand.u32 2147483648, %v82_v39  ;;  %v110_v61 = vadd.f32 %v655_v48, %v734_v54 }
  0x2c   :  { %v332_v52 = vand.u32 2147483647, %v331_v43  ;;  %v91_v53 = vadd.f32 %v679_v4, %v90_v45  ;;  %v68_v55 = vadd.f32 %v67_v46, %v66_v35  ;;  %vm736_vm10 = vcmp.lt.f32.partialorder %v336_v47, 8388608.0 }
  0x2d   :  { %v339_v56 = vcvt.s32.f32 %v338_v50  ;;  %v119_v0 = vadd.f32 %v659_v49, %v655_v48  ;;  %v120_v1 = vadd.f32 %v723_v41, %v710_v30  ;;  %v131_v6 = vadd.f32 %v710_v30, %v61_v15 }
  0x2e   :  { %v334_v58 = vor.u32 %v333_v44, %v332_v52  ;;  %v92_v60 = vmul.f32 0.2, %v91_v53  ;;  %v100_v63 = vsub.f32 %v68_v55, %v679_v4  ;;  %v111_v11 = vmul.f32 0.33333334, %v110_v61 }
  0x2f   :  { %v340_v62 = vand.u32 2147483647, %v339_v56  ;;  %v113_v48 = vmul.f32 %v659_v49, %v706_v29  ;;  %v121_v15 = vadd.f32 %v120_v1, %v119_v0  ;;  %v132_v23 = vmul.f32 0.33333334, %v131_v6 }
  0x30   :  { %v335_v2 = vsel %vm329_vm9, %v334_v58, %v70_v28  ;;  %v344_v3 = vand.u32 2147483647, %v92_v60  ;;  %v346_v5 = vcvt.f32.s32 %v92_v60  ;;  %v101_v9 = vmul.f32 0.125, %v100_v63 }
  0x31   :  { %v75_v7 = vmul.f32 %v335_v2, %v713_v31  ;;  %v342_v8 = vor.u32 %v341_v57, %v340_v62  ;;  %v349_v13 = vand.u32 2147483648, %v92_v60  ;;  %v362_v27 = vcvt.f32.s32 %v111_v11 }
  0x32   :  { %vm749_vm11 = vcmp.lt.f32.partialorder %v344_v3, 8388608.0  ;;  %v347_v12 = vcvt.s32.f32 %v346_v5  ;;  %v354_v18 = vcvt.f32.s32 %v101_v9  ;;  %v352_v21 = vand.u32 2147483647, %v101_v9 }
  0x33   :  { %v76_v14 = vadd.f32 %v75_v7, %v73_v38  ;;  %v343_v17 = vsel %vm736_vm10, %v342_v8, %v82_v39  ;;  %v357_v25 = vand.u32 2147483648, %v101_v9  ;;  %v360_v33 = vand.u32 2147483647, %v111_v11 }
  0x34   :  { %v85_v19 = vmul.f32 %v343_v17, %v713_v31  ;;  %v348_v20 = vand.u32 2147483647, %v347_v12  ;;  %v355_v24 = vcvt.s32.f32 %v354_v18  ;;  %v365_v34 = vand.u32 2147483648, %v111_v11 }
  0x35   :  { %545 = vtanh.f32 %v76_v14  ;;  %v363_v35 = vcvt.s32.f32 %v362_v27  ;;  %v122_v36 = vadd.f32 %v679_v4, %v121_v15  ;;  %v376_v37 = vand.u32 2147483647, %v132_v23 }
  0x36   :  { %v86_v28 = vadd.f32 %v85_v19, %v84_v40  ;;  %v350_v32 = vor.u32 %v349_v13, %v348_v20  ;;  %v356_v49 = vand.u32 2147483647, %v355_v24  ;;  %vm353_vm12 = vcmp.lt.f32.partialorder %v352_v21, 8388608.0 }
  0x37   :  { %v378_v39 = vcvt.f32.s32 %v132_v23  ;;  %v364_v45 = vand.u32 2147483647, %v363_v35  ;;  %v123_v46 = vmul.f32 0.2, %v122_v36  ;;  %vm762_vm13 = vcmp.lt.f32.partialorder %v360_v33, 8388608.0 }
  0x38   :  { %547 = vtanh.f32 %v86_v28  ;;  %v351_v38 = vsel %vm749_vm11, %v350_v32, %v92_v60  ;;  %v358_v44 = vor.u32 %v357_v25, %v356_v49  ;;  %v381_v50 = vand.u32 2147483648, %v132_v23 }
  0x39   :  { %v95_v43 = vmul.f32 %v351_v38, %v713_v31  ;;  %v379_v47 = vcvt.s32.f32 %v378_v39  ;;  %v140_v4 = vadd.f32 %v723_v41, %v703_v26  ;;  %v366_v55 = vor.u32 %v365_v34, %v364_v45 }
  0x3a   :  { %v359_v53 = vsel %vm353_vm12, %v358_v44, %v101_v9  ;;  %vm768_vm14 = vcmp.lt.f32.partialorder %v376_v37, 8388608.0  ;;  %v368_v58 = vand.u32 2147483647, %v123_v46  ;;  %v370_v59 = vcvt.f32.s32 %v123_v46 }
  0x3b   :  { %v96_v52 = vadd.f32 %v95_v43, %v94_v51  ;;  %v104_v57 = vmul.f32 %v359_v53, %v713_v31  ;;  %v380_v60 = vand.u32 2147483647, %v379_v47  ;;  %v367_v61 = vsel %vm762_vm13, %v366_v55, %v111_v11 }
  0x3c   :  { %v373_v62 = vand.u32 2147483648, %v123_v46  ;;  %v141_v63 = vadd.f32 %v140_v4, %v696_v22  ;;  %v114_v0 = vmul.f32 %v367_v61, %v713_v31  ;;  %v371_v1 = vcvt.s32.f32 %v370_v59 }
  0x3d   :  { %549 = vtanh.f32 %v96_v52  ;;  %v105_v51 = vadd.f32 %v104_v57, %v730_v42  ;;  %v382_v2 = vor.u32 %v381_v50, %v380_v60  ;;  %v134_v3 = vmul.f32 %v703_v26, %v706_v29 }
  0x3e   :  { %v142_v5 = vmul.f32 0.2, %v141_v63  ;;  %v150_v6 = vadd.f32 %v710_v30, %v734_v54  ;;  %v115_v7 = vadd.f32 %v114_v0, %v113_v48  ;;  %v372_v8 = vand.u32 2147483647, %v371_v1 }
  0x3f   :  { %551 = vtanh.f32 %v105_v51  ;;  %v383_v9 = vsel %vm768_vm14, %v382_v2, %v132_v23  ;;  %vm784_vm15 = vcmp.lt.f32.partialorder %v368_v58, 8388608.0  ;;  %v125_v42 = vmul.f32 %v692_v16, %v706_v29 }
  0x40   :  { %v135_v11 = vmul.f32 %v383_v9, %v713_v31  ;;  %v386_v26 = vcvt.f32.s32 %v142_v5  ;;  %553 = vtanh.f32 %v115_v7  ;;  %v374_v12 = vor.u32 %v373_v62, %v372_v8 }
  0x41   :  { %v384_v54 = vand.u32 2147483647, %v142_v5  ;;  %v151_v13 = vmul.f32 0.33333334, %v150_v6  ;;  %v389_v18 = vand.u32 2147483648, %v142_v5  ;;  %v144_v49 = vmul.f32 %v710_v30, %v706_v29 }
  0x42   :  { %v546_v10 = vpop.eup %545  ;;  %v136_v14 = vadd.f32 %v135_v11, %v134_v3  ;;  %v387_v17 = vcvt.s32.f32 %v386_v26  ;;  %v375_v15 = vsel %vm784_vm15, %v374_v12, %v123_v46  ;;  %v153_v46 = vmul.f32 %v723_v41, %v706_v29 }
  0x43   :  { %v78_v48 = vmul.f32 0.5, %v546_v10  ;;  %v392_v19 = vand.u32 2147483647, %v151_v13  ;;  %v394_v20 = vcvt.f32.s32 %v151_v13  ;;  %v126_v16 = vmul.f32 %v375_v15, %v713_v31 }
  0x44   :  { %555 = vtanh.f32 %v136_v14  ;;  %v388_v24 = vand.u32 2147483647, %v387_v17  ;;  %vm385_vm0 = vcmp.lt.f32.partialorder %v384_v54, 8388608.0  ;;  %v397_v28 = vand.u32 2147483648, %v151_v13 }
  0x45   :  { %v548_v21 = vpop.eup %547  ;;  %v79_v23 = vadd.f32 0.5, %v78_v48  ;;  %v395_v27 = vcvt.s32.f32 %v394_v20  ;;  %v127_v32 = vadd.f32 %v126_v16, %v125_v42  ;;  %vm393_vm1 = vcmp.lt.f32.partialorder %v392_v19, 8388608.0 }
  0x46   :  { %v88_v25 = vmul.f32 0.5, %v548_v21  ;;  %v390_v33 = vor.u32 %v389_v18, %v388_v24 }
  0x47   :  { %v396_v35 = vand.u32 2147483647, %v395_v27  ;;  %557 = vtanh.f32 %v127_v32  ;;  %v796_v37 = vmul.f32 10000.0, %v79_v23 }
  0x48   :  { %v89_v34 = vadd.f32 0.5, %v88_v25  ;;  %v391_v36 = vsel %vm385_vm0, %v390_v33, %v142_v5 }
  0x49   :  { %v145_v39 = vmul.f32 %v391_v36, %v713_v31  ;;  %v398_v43 = vor.u32 %v397_v28, %v396_v35  ;;  %v402_v52 = vcvt.f32.s32 %v796_v37  ;;  %v400_v51 = vand.u32 2147483647, %v796_v37 }
  0x4a   :  { %v550_v38 = vpop.eup %549  ;;  %v799_v44 = vmul.f32 10000.0, %v89_v34  ;;  %v405_v3 = vand.u32 2147483648, %v796_v37 }
  0x4b   :  { %v98_v45 = vmul.f32 0.5, %v550_v38  ;;  %v146_v40 = vadd.f32 %v145_v39, %v144_v49  ;;  %v399_v47 = vsel %vm393_vm1, %v398_v43, %v151_v13  ;;  %v403_v61 = vcvt.s32.f32 %v402_v52 }
  0x4c   :  { %v552_v50 = vpop.eup %551  ;;  %v154_v4 = vmul.f32 %v399_v47, %v713_v31  ;;  %v410_v55 = vcvt.f32.s32 %v799_v44  ;;  %v408_v7 = vand.u32 2147483647, %v799_v44  ;;  %v413_v26 = vand.u32 2147483648, %v799_v44 }
  0x4d   :  { %v99_v30 = vadd.f32 0.5, %v98_v45  ;;  %v107_v53 = vmul.f32 0.5, %v552_v50  ;;  %559 = vtanh.f32 %v146_v40  ;;  %v554_v56 = vpop.eup %553  ;;  %v404_v11 = vand.u32 2147483647, %v403_v61 }
  0x4e   :  { %v155_v57 = vadd.f32 %v154_v4, %v153_v46  ;;  %v117_v60 = vmul.f32 0.5, %v554_v56  ;;  %v411_v0 = vcvt.s32.f32 %v410_v55  ;;  %vm401_vm3 = vcmp.lt.f32.partialorder %v400_v51, 8388608.0 }
  0x4f   :  { %v165_v58 = vmul.f32 10000.0, %v99_v30  ;;  %v108_v59 = vadd.f32 0.5, %v107_v53  ;;  %v406_v23 = vor.u32 %v405_v3, %v404_v11  ;;  %vm409_vm5 = vcmp.lt.f32.partialorder %v408_v7, 8388608.0 }
  0x50   :  { %561 = vtanh.f32 %v155_v57  ;;  %v118_v63 = vadd.f32 0.5, %v117_v60  ;;  %v412_v54 = vand.u32 2147483647, %v411_v0 }
  0x51   :  { %v426_v41 = vcvt.f32.s32 %v165_v58  ;;  %v556_v62 = vpop.eup %555  ;;  %v167_v1 = vmul.f32 10000.0, %v108_v59  ;;  %v429_v6 = vand.u32 2147483648, %v165_v58  ;;  %v424_v9 = vand.u32 2147483647, %v165_v58 }
  0x52   :  { %v138_v2 = vmul.f32 0.5, %v556_v62  ;;  %v809_v8 = vmul.f32 10000.0, %v118_v63  ;;  %v414_v24 = vor.u32 %v413_v26, %v412_v54  ;;  %v820_v38 = vsel %vm401_vm3, %v406_v23, %v796_v37 }
  0x53   :  { %v427_v5 = vcvt.s32.f32 %v426_v41  ;;  %v434_v22 = vcvt.f32.s32 %v167_v1  ;;  %v432_v48 = vand.u32 2147483647, %v167_v1  ;;  %v437_v14 = vand.u32 2147483648, %v167_v1 }
  0x54   :  { %v139_v42 = vadd.f32 0.5, %v138_v2  ;;  %v558_v12 = vpop.eup %557  ;;  %v418_v13 = vcvt.f32.s32 %v809_v8  ;;  %vm425_vm2 = vcmp.lt.f32.partialorder %v424_v9, 8388608.0  ;;  %v421_v35 = vand.u32 2147483648, %v809_v8 }
  0x55   :  { %v428_v10 = vand.u32 2147483647, %v427_v5  ;;  %v129_v17 = vmul.f32 0.5, %v558_v12  ;;  %v435_v15 = vcvt.s32.f32 %v434_v22  ;;  %vm433_vm4 = vcmp.lt.f32.partialorder %v432_v48, 8388608.0 }
  0x56   :  { %v813_v19 = vmul.f32 10000.0, %v139_v42  ;;  %v419_v20 = vcvt.s32.f32 %v418_v13  ;;  %v416_v39 = vand.u32 2147483647, %v809_v8  ;;  %v826_v47 = vsel %vm409_vm5, %v414_v24, %v799_v44 }
  0x57   :  { %v430_v18 = vor.u32 %v429_v6, %v428_v10  ;;  %v130_v21 = vadd.f32 0.5, %v129_v17  ;;  %v436_v16 = vand.u32 2147483647, %v435_v15  ;;  %v179_v62 = vadd.f32 %v826_v47, %v820_v38 }
  0x58   :  { %v450_v25 = vcvt.f32.s32 %v813_v19  ;;  %v420_v49 = vand.u32 2147483647, %v419_v20  ;;  %v453_v37 = vand.u32 2147483648, %v813_v19  ;;  %vm417_vm6 = vcmp.lt.f32.partialorder %v416_v39, 8388608.0 }
  0x59   :  { %v816_v28 = vsel %vm425_vm2, %v430_v18, %v165_v58  ;;  %v438_v32 = vor.u32 %v437_v14, %v436_v16  ;;  %v169_v33 = vmul.f32 10000.0, %v130_v21  ;;  %v448_v44 = vand.u32 2147483647, %v813_v19 }
  0x5a   :  { %v560_v27 = vpop.eup %559  ;;  %v451_v36 = vcvt.s32.f32 %v450_v25  ;;  %v422_v55 = vor.u32 %v421_v35, %v420_v49 }
  0x5b   :  { %v148_v34 = vmul.f32 0.5, %v560_v27  ;;  %v823_v43 = vsel %vm433_vm4, %v438_v32, %v167_v1  ;;  %v442_v45 = vcvt.f32.s32 %v169_v33  ;;  %v440_v50 = vand.u32 2147483647, %v169_v33 }
  0x5c   :  { %v177_v30 = vadd.f32 %v823_v43, %v816_v28  ;;  %v445_v53 = vand.u32 2147483648, %v169_v33  ;;  %v452_v56 = vand.u32 2147483647, %v451_v36  ;;  %v423_v2 = vsel %vm417_vm6, %v422_v55, %v809_v8 }
  0x5d   :  { %v562_v46 = vpop.eup %561  ;;  %v149_v40 = vadd.f32 0.5, %v148_v34  ;;  %v443_v52 = vcvt.s32.f32 %v442_v45  ;;  %vm833_vm7 = vcmp.lt.f32.partialorder %v440_v50, 8388608.0  ;;  %vm842_vm8 = vcmp.lt.f32.partialorder %v448_v44, 8388608.0 }
  0x5e   :  { %v157_v4 = vmul.f32 0.5, %v562_v46  ;;  %v185_v58 = vadd.f32 %v826_v47, %v177_v30  ;;  %v454_v3 = vor.u32 %v453_v37, %v452_v56  ;;  %v194_v42 = vadd.f32 %v423_v2, %v820_v38 }
  0x5f   :  { %v173_v57 = vmul.f32 10000.0, %v149_v40  ;;  %v444_v60 = vand.u32 2147483647, %v443_v52  ;;  %v181_v14 = vadd.f32 %v423_v2, %v179_v62  ;;  %v198_v37 = vmul.f32 %v826_v47, %v706_v29 }
  0x60   :  { %v158_v59 = vadd.f32 0.5, %v157_v4  ;;  %v186_v1 = vmul.f32 0.33333334, %v185_v58  ;;  %v455_v13 = vsel %vm842_vm8, %v454_v3, %v813_v19 }
  0x61   :  { %v458_v41 = vcvt.f32.s32 %v173_v57  ;;  %v446_v63 = vor.u32 %v445_v53, %v444_v60  ;;  %v456_v51 = vand.u32 2147483647, %v173_v57  ;;  %v461_v6 = vand.u32 2147483648, %v173_v57 }
  0x62   :  { %v175_v0 = vmul.f32 10000.0, %v158_v59  ;;  %v474_v10 = vcvt.f32.s32 %v186_v1  ;;  %v477_v23 = vand.u32 2147483648, %v186_v1  ;;  %v472_v25 = vand.u32 2147483647, %v186_v1 }
  0x63   :  { %v459_v5 = vcvt.s32.f32 %v458_v41  ;;  %v447_v7 = vsel %vm833_vm7, %v446_v63, %v169_v33  ;;  %vm457_vm9 = vcmp.lt.f32.partialorder %v456_v51, 8388608.0 }
  0x64   :  { %v466_v22 = vcvt.f32.s32 %v175_v0  ;;  %v464_v26 = vand.u32 2147483647, %v175_v0  ;;  %v469_v54 = vand.u32 2147483648, %v175_v0  ;;  %v178_v8 = vadd.f32 %v447_v7, %v177_v30 }
  0x65   :  { %v460_v11 = vand.u32 2147483647, %v459_v5  ;;  %v475_v17 = vcvt.s32.f32 %v474_v10  ;;  %vm473_vm11 = vcmp.lt.f32.partialorder %v472_v25, 8388608.0 }
  0x66   :  { %v467_v12 = vcvt.s32.f32 %v466_v22  ;;  %v195_v15 = vadd.f32 %v194_v42, %v178_v8  ;;  %vm465_vm10 = vcmp.lt.f32.partialorder %v464_v26, 8388608.0  ;;  %v182_v32 = vadd.f32 %v181_v14, %v178_v8 }
  0x67   :  { %v462_v48 = vor.u32 %v461_v6, %v460_v11  ;;  %v476_v21 = vand.u32 2147483647, %v475_v17  ;;  %v217_v22 = vmul.f32 %v823_v43, %v706_v29 }
  0x68   :  { %v468_v18 = vand.u32 2147483647, %v467_v12  ;;  %v196_v27 = vmul.f32 0.2, %v195_v15 }
  0x69   :  { %v463_v20 = vsel %vm457_vm9, %v462_v48, %v173_v57  ;;  %v478_v35 = vor.u32 %v477_v23, %v476_v21  ;;  %v188_v57 = vmul.f32 %v820_v38, %v706_v29  ;;  %v208_v38 = vmul.f32 %v816_v28, %v706_v29 }
  0x6a   :  { %v470_v16 = vor.u32 %v469_v54, %v468_v18  ;;  %v180_v24 = vadd.f32 %v463_v20, %v455_v13  ;;  %v482_v34 = vcvt.f32.s32 %v196_v27  ;;  %v480_v36 = vand.u32 2147483647, %v196_v27 }
  0x6b   :  { %v485_v45 = vand.u32 2147483648, %v196_v27  ;;  %v479_v30 = vsel %vm473_vm11, %v478_v35, %v186_v1 }
  0x6c   :  { %v471_v33 = vsel %vm465_vm10, %v470_v16, %v175_v0  ;;  %v204_v19 = vadd.f32 %v180_v24, %v179_v62  ;;  %v483_v39 = vcvt.s32.f32 %v482_v34  ;;  %vm481_vm12 = vcmp.lt.f32.partialorder %v480_v36, 8388608.0 }
  0x6d   :  { %v183_v49 = vadd.f32 %v471_v33, %v180_v24  ;;  %v189_v58 = vmul.f32 %v479_v30, %v713_v31 }
  0x6e   :  { %v205_v40 = vadd.f32 %v823_v43, %v204_v19  ;;  %v484_v50 = vand.u32 2147483647, %v483_v39 }
  0x6f   :  { %v184_v46 = vadd.f32 %v183_v49, %v182_v32  ;;  %v190_v1 = vadd.f32 %v189_v58, %v188_v57 }
  0x70   :  { %v206_v4 = vmul.f32 0.2, %v205_v40  ;;  %v486_v53 = vor.u32 %v485_v45, %v484_v50 }
  0x71   :  { %v214_v52 = vsub.f32 %v184_v46, %v823_v43 }
  0x72   :  { %v490_v55 = vcvt.f32.s32 %v206_v4  ;;  %v487_v59 = vsel %vm481_vm12, %v486_v53, %v196_v27  ;;  %v488_v60 = vand.u32 2147483647, %v206_v4  ;;  %v493_v41 = vand.u32 2147483648, %v206_v4 }
  0x73   :  { %v215_v56 = vmul.f32 0.125, %v214_v52  ;;  %v199_v44 = vmul.f32 %v487_v59, %v713_v31 }
  0x74   :  { %v491_v61 = vcvt.s32.f32 %v490_v55  ;;  %vm489_vm13 = vcmp.lt.f32.partialorder %v488_v60, 8388608.0 }
  0x75   :  { %v498_v62 = vcvt.f32.s32 %v215_v56  ;;  %v200_v63 = vadd.f32 %v199_v44, %v198_v37  ;;  %v496_v0 = vand.u32 2147483647, %v215_v56  ;;  %v501_v2 = vand.u32 2147483648, %v215_v56 }
  0x76   :  { %v492_v51 = vand.u32 2147483647, %v491_v61 }
  0x77   :  { %v499_v47 = vcvt.s32.f32 %v498_v62  ;;  %563 = vtanh.f32 %v200_v63  ;;  %vm497_vm14 = vcmp.lt.f32.partialorder %v496_v0, 8388608.0 }
  0x78   :  { %v494_v3 = vor.u32 %v493_v41, %v492_v51  ;;  %565 = vtanh.f32 %v190_v1 }
  0x79   :  { %v500_v5 = vand.u32 2147483647, %v499_v47 }
  0x7a   :  { %v495_v6 = vsel %vm489_vm13, %v494_v3, %v206_v4 }
  0x7b   :  { %v209_v7 = vmul.f32 %v495_v6, %v713_v31  ;;  %v502_v9 = vor.u32 %v501_v2, %v500_v5 }
  0x7d   :  { %v210_v42 = vadd.f32 %v209_v7, %v208_v38  ;;  %v503_v11 = vsel %vm497_vm14, %v502_v9, %v215_v56 }
  0x7e   :  { %v218_v26 = vmul.f32 %v503_v11, %v713_v31 }
  0x7f   :  { %567 = vtanh.f32 %v210_v42 }
  0x80   :  { %v219_v10 = vadd.f32 %v218_v26, %v217_v22 }
  0x82   :  { %569 = vtanh.f32 %v219_v10 }
  0x84   :  { %v564_v12 = vpop.eup %563 }
  0x85   :  { %v202_v54 = vmul.f32 0.5, %v564_v12  ;;  %v566_v28 = vpop.eup %565 }
  0x86   :  { %v192_v48 = vmul.f32 0.5, %v566_v28 }
  0x87   :  { %v203_v8 = vadd.f32 0.5, %v202_v54 }
  0x88   :  { %v193_v21 = vadd.f32 0.5, %v192_v48 }
  0x89   :  { %v225_v13 = vmul.f32 10000.0, %v203_v8 }
  0x8a   :  { %v223_v33 = vmul.f32 10000.0, %v193_v21 }
  0x8b   :  { %v514_v17 = vcvt.f32.s32 %v225_v13  ;;  %v517_v24 = vand.u32 2147483648, %v225_v13  ;;  %v512_v32 = vand.u32 2147483647, %v225_v13 }
  0x8c   :  { %v568_v14 = vpop.eup %567  ;;  %v506_v46 = vcvt.f32.s32 %v223_v33  ;;  %v509_v44 = vand.u32 2147483648, %v223_v33  ;;  %v504_v41 = vand.u32 2147483647, %v223_v33 }
  0x8d   :  { %v212_v18 = vmul.f32 0.5, %v568_v14  ;;  %v515_v15 = vcvt.s32.f32 %v514_v17  ;;  %vm513_vm15 = vcmp.lt.f32.partialorder %v512_v32, 8388608.0 }
  0x8e   :  { %v507_v55 = vcvt.s32.f32 %v506_v46  ;;  %vm505_vm2 = vcmp.lt.f32.partialorder %v504_v41, 8388608.0 }
  0x8f   :  { %v570_v20 = vpop.eup %569  ;;  %v213_v43 = vadd.f32 0.5, %v212_v18  ;;  %v516_v16 = vand.u32 2147483647, %v515_v15 }
  0x90   :  { %v221_v23 = vmul.f32 0.5, %v570_v20  ;;  %v508_v60 = vand.u32 2147483647, %v507_v55 }
  0x91   :  { %v227_v25 = vmul.f32 10000.0, %v213_v43  ;;  %v518_v36 = vor.u32 %v517_v24, %v516_v16 }
  0x92   :  { %v222_v27 = vadd.f32 0.5, %v221_v23  ;;  %v510_v63 = vor.u32 %v509_v44, %v508_v60 }
  0x93   :  { %v522_v34 = vcvt.f32.s32 %v227_v25  ;;  %v520_v49 = vand.u32 2147483647, %v227_v25  ;;  %v525_v39 = vand.u32 2147483648, %v227_v25  ;;  %v519_v52 = vsel %vm513_vm15, %v518_v36, %v225_v13 }
  0x94   :  { %v229_v35 = vmul.f32 10000.0, %v222_v27  ;;  %v511_v2 = vsel %vm505_vm2, %v510_v63, %v223_v33 }
  0x95   :  { %v523_v19 = vcvt.s32.f32 %v522_v34  ;;  %vm521_vm0 = vcmp.lt.f32.partialorder %v520_v49, 8388608.0  ;;  %v235_v5 = vmul.f32 %v511_v2, %v706_v29 }
  0x96   :  { %v530_v45 = vcvt.f32.s32 %v229_v35  ;;  %v528_v50 = vand.u32 2147483647, %v229_v35  ;;  %v533_v4 = vand.u32 2147483648, %v229_v35 }
  0x97   :  { %v524_v40 = vand.u32 2147483647, %v523_v19 }
  0x98   :  { %v531_v30 = vcvt.s32.f32 %v530_v45  ;;  %vm529_vm1 = vcmp.lt.f32.partialorder %v528_v50, 8388608.0 }
  0x99   :  { %v526_v53 = vor.u32 %v525_v39, %v524_v40 }
  0x9a   :  { %v532_v37 = vand.u32 2147483647, %v531_v30 }
  0x9b   :  { %v527_v56 = vsel %vm521_vm0, %v526_v53, %v227_v25 }
  0x9c   :  { %v534_v57 = vor.u32 %v533_v4, %v532_v37  ;;  %v231_v58 = vadd.f32 %v527_v56, %v519_v52 }
  0x9e   :  { %v535_v59 = vsel %vm529_vm1, %v534_v57, %v229_v35 }
  0x9f   :  { %v232_v61 = vadd.f32 %v535_v59, %v231_v58 }
  0xa1   :  { %v233_v62 = vmul.f32 0.33333334, %v232_v61 }
  0xa3   :  { %v538_v51 = vcvt.f32.s32 %v233_v62  ;;  %v536_v0 = vand.u32 2147483647, %v233_v62  ;;  %v541_v47 = vand.u32 2147483648, %v233_v62 }
  0xa5   :  { %v539_v1 = vcvt.s32.f32 %v538_v51  ;;  %vm537_vm3 = vcmp.lt.f32.partialorder %v536_v0, 8388608.0 }
  0xa7   :  { %v540_v3 = vand.u32 2147483647, %v539_v1 }
  0xa9   :  { %v542_v38 = vor.u32 %v541_v47, %v540_v3 }
  0xab   :  { %v543_v6 = vsel %vm537_vm3, %v542_v38, %v233_v62 }
  0xac   :  { %v236_v7 = vmul.f32 %v543_v6, %v713_v31 }
  0xae   :  { %v237_v9 = vadd.f32 %v236_v7, %v235_v5 }
  0xb0   :  { %571 = vtanh.f32 %v237_v9 }
  0xbd   :  { %v572_v22 = vpop.eup %571 }
  0xbe   :  { %v239_v42 = vmul.f32 0.5, %v572_v22 }
  0xc0   :  { %v240_v11 = vadd.f32 0.5, %v239_v42 }
  0xc2   :  { %241 = vst [vmem:[%s871_s2] sm:$0xff] %v240_v11 }
  0xc3   :  { %246 = vsyncpa [#allocation3], 1 }

</bundles_post_ra>
